<compile_context>
chip_gen: v5e
topology: v5e:2x2
jax: 0.10.0
libtpu: 0.0.40
codegen_flags: <defaults>
</compile_context>

<pallas_src>
import functools

import jax
import jax.numpy as jnp
import numpy as np
from jax.experimental import pallas as pl
from jax.experimental.pallas import tpu as pltpu


def _gatv2_kernel(h_ref, w_ref, s_ref, bias_ref, r_ref, dmask_ref, sel_ref,
                  padm_ref, o_ref, *, n_nodes, n_heads, n_hidden, slope,
                  matmul_dtype):
    """One graph per grid step, fully VMEM-resident.

    h_ref     : [N, F_in]        node features
    w_ref     : [F_in, H*F']     shared linear weight (transposed)
    s_ref     : [H*F', H]        block-diag attention selector (from aw)
    bias_ref  : [N*N, 1]         additive adjacency bias (0 / -1e30)
    r_ref     : [H, H*N]         lane-expansion selector  (kron(I_H, 1_N))
    dmask_ref : [N*N, H*N]       delta(j, j') mask
    sel_ref   : [N, N*N]         row-group selector       (kron(I_N, 1_N))
    padm_ref  : [F', F_pad]      lane-padding matrix      ([I | 0])
    o_ref     : [N, F_pad]       output (mean over heads, lane padded)
    """
    N, H, F = n_nodes, n_heads, n_hidden
    HF = H * F
    mm = matmul_dtype

    # (1) shared projection: g_l == g_r == g  (share_weights=True).
    g = jnp.dot(h_ref[...].astype(mm), w_ref[...].astype(mm),
                preferred_element_type=jnp.float32)               # [N, H*F']

    # (2) all heads at once: pairwise sums + LeakyReLU over the full lane axis.
    gsum = g[:, None, :] + g[None, :, :]                          # [N, N, H*F']
    act = jnp.where(gsum >= 0, gsum, slope * gsum)                # LeakyReLU(0.2)

    # (3) attention scores for every head with ONE MXU matmul (no XLU reduce).
    act2 = act.reshape(N * N, HF)                                 # tile-aligned merge
    e2 = jnp.dot(act2.astype(mm), s_ref[...].astype(mm),
                 preferred_element_type=jnp.float32)              # [N*N, H]

    # (4) adjacency mask as an additive bias (lane-broadcast over heads).
    e2 = e2 + bias_ref[...]                                       # [N*N, H]

    # (5) softmax over neighbours j, rows grouped per query node i.
    e3 = e2.reshape(N, N, H)                                      # [i, j, h]
    m3 = jnp.max(e3, axis=1, keepdims=True)                       # [N, 1, H]
    p3 = jnp.exp(e3 - m3)                                         # [N, N, H]
    d3 = jnp.sum(p3, axis=1, keepdims=True)                       # [N, 1, H]
    # N*H reciprocals instead of an N*N*H divide; fold the mean over heads.
    # (pl.reciprocal(..., approx=True) is the EUP fast path for production.)
    inv = pl.reciprocal(d3, approx=False) * (1.0 / H)             # [N, 1, H]
    pn2 = (p3 * inv).reshape(N * N, H)                            # [N*N, H]

    # (6) relayout on the MXU:  A_all[i, h*N + j] = pn[i, j, h].
    z = jnp.dot(pn2, r_ref[...],
                preferred_element_type=jnp.float32) * dmask_ref[...]   # [N*N, H*N]
    a_all = jnp.dot(sel_ref[...], z,
                    preferred_element_type=jnp.float32)           # [N, H*N]

    # (7) fused output matmul over all heads:  out = sum_h A_h @ G_h.
    g_all = jnp.concatenate([g[:, hd * F:(hd + 1) * F] for hd in range(H)],
                            axis=0)                               # [H*N, F']
    out = jnp.dot(a_all.astype(mm), g_all.astype(mm),
                  preferred_element_type=jnp.float32)             # [N, F']

    # (8) lane-dense store: pad F' -> F_pad via a constant matmul (full vst).
    o_ref[...] = jnp.dot(out, padm_ref[...],
                         preferred_element_type=jnp.float32)      # [N, F_pad]


def _build_constants(attn_w, n_nodes, n_heads, n_hidden, f_pad):
    """Tiny constant selector matrices (built once in plain XLA)."""
    N, H, F = n_nodes, n_heads, n_hidden
    aw = attn_w.reshape(F).astype(jnp.float32)
    eye_h = jnp.eye(H, dtype=jnp.float32)
    eye_n = jnp.eye(N, dtype=jnp.float32)
    s = jnp.kron(eye_h, aw.reshape(F, 1))                         # [H*F, H]
    r = jnp.kron(eye_h, jnp.ones((1, N), jnp.float32))            # [H, H*N]
    dmask = jnp.tile(eye_n, (N, H))                               # [N*N, H*N]
    sel = jnp.kron(eye_n, jnp.ones((1, N), jnp.float32))          # [N, N*N]
    padm = jnp.concatenate(
        [jnp.eye(F, dtype=jnp.float32),
         jnp.zeros((F, f_pad - F), jnp.float32)], axis=1)         # [F, F_pad]
    return s, r, dmask, sel, padm


def gatv2_1l_forward_batched(h, w, attn_w, adj, *, n_heads, n_hidden,
                             slope=0.2, matmul_dtype=jnp.float32):
    """Batched forward: h [B,N,F_in], adj [B,N,N] -> [B,N,F'] (mean over heads)."""
    B, N, f_in = h.shape
    H, F = n_heads, n_hidden
    HF = H * F
    assert w.shape == (f_in, HF)
    f_pad = ((F + 127) // 128) * 128

    s, r, dmask, sel, padm = _build_constants(attn_w, N, H, F, f_pad)
    # Additive mask bias (0 for edges, -1e30 otherwise): cheaper than -inf
    # masked_fill and avoids inf-inf NaNs for isolated nodes.
    bias = jnp.where(adj != 0, 0.0, -1e30).astype(jnp.float32).reshape(B, N * N, 1)

    kernel = functools.partial(_gatv2_kernel, n_nodes=N, n_heads=H, n_hidden=F,
                               slope=slope, matmul_dtype=matmul_dtype)

    out_padded = pl.pallas_call(
        kernel,
        out_shape=jax.ShapeDtypeStruct((B, N, f_pad), jnp.float32),
        grid_spec=pltpu.PrefetchScalarGridSpec(
            num_scalar_prefetch=0,
            grid=(B,),
            in_specs=[
                pl.BlockSpec((None, N, f_in), lambda b: (b, 0, 0)),    # h
                pl.BlockSpec((f_in, HF), lambda b: (0, 0)),            # w
                pl.BlockSpec((HF, H), lambda b: (0, 0)),               # s
                pl.BlockSpec((None, N * N, 1), lambda b: (b, 0, 0)),   # bias
                pl.BlockSpec((H, H * N), lambda b: (0, 0)),            # r
                pl.BlockSpec((N * N, H * N), lambda b: (0, 0)),        # dmask
                pl.BlockSpec((N, N * N), lambda b: (0, 0)),            # sel
                pl.BlockSpec((F, f_pad), lambda b: (0, 0)),            # padm
            ],
            out_specs=pl.BlockSpec((None, N, f_pad), lambda b: (b, 0, 0)),
        ),
        compiler_params=pltpu.CompilerParams(
            dimension_semantics=("parallel",),
            vmem_limit_bytes=32 * 1024 * 1024),
    )(h, w, s, bias, r, dmask, sel, padm)

    return out_padded[:, :, :F]


def gatv2_1l_forward(h, w, attn_w, adj, *, n_heads, n_hidden, slope=0.2,
                     matmul_dtype=jnp.float32):
    """Single-graph forward matching GATv2_1L.forward (eval mode)."""
    out = gatv2_1l_forward_batched(h[None], w, attn_w, adj[None],
                                   n_heads=n_heads, n_hidden=n_hidden,
                                   slope=slope, matmul_dtype=matmul_dtype)
    return out[0]


def _reference(h, w, attn_w, adj, *, n_heads, n_hidden, slope=0.2):
    """Pure-JAX reference matching the PyTorch forward (eval mode)."""
    n = h.shape[0]
    g = (h @ w).reshape(n, n_heads, n_hidden)               # g_l == g_r
    gsum = g[None, :, :, :] + g[:, None, :, :]              # [i, j, h, f] = g[j]+g[i]
    act = jnp.where(gsum >= 0, gsum, slope * gsum)
    e = jnp.einsum('ijhf,f->ijh', act, attn_w[0])
    e = jnp.where(adj[:, :, None] != 0, e, -jnp.inf)
    a = jax.nn.softmax(e, axis=1)
    attn_res = jnp.einsum('ijh,jhf->ihf', a, g)
    return attn_res.mean(axis=1)


if __name__ == "__main__":
    n_nodes = 8
    in_features = 32
    n_classes = 16          # == n_hidden (is_concat=False)
    n_heads = 4
    batch = 4

    key = jax.random.PRNGKey(0)
    k_h, k_w, k_a, k_adj = jax.random.split(key, 4)

    h = jax.random.normal(k_h, (n_nodes, in_features), dtype=jnp.float32)

    bound_w = 1.0 / np.sqrt(in_features)
    w = jax.random.uniform(k_w, (in_features, n_heads * n_classes),
                           minval=-bound_w, maxval=bound_w, dtype=jnp.float32)

    bound_a = 1.0 / np.sqrt(n_classes)
    attn_w = jax.random.uniform(k_a, (1, n_classes),
                                minval=-bound_a, maxval=bound_a,
                                dtype=jnp.float32)

    adj = (jax.random.uniform(k_adj, (n_nodes, n_nodes)) < 0.4).astype(jnp.float32)
    adj = jnp.maximum(adj, jnp.eye(n_nodes, dtype=jnp.float32))

    # Single graph (matches the module's forward interface).
    out = gatv2_1l_forward(h, w, attn_w, adj,
                           n_heads=n_heads, n_hidden=n_classes)
    out = jax.block_until_ready(out)
    ref = _reference(h, w, attn_w, adj, n_heads=n_heads, n_hidden=n_classes)
    np.testing.assert_allclose(np.asarray(out), np.asarray(ref),
                               rtol=1e-4, atol=1e-4)

    # Batched graphs: one grid step per graph, 'parallel' over the batch axis.
    kb = jax.random.split(jax.random.PRNGKey(1), 2)
    hb = jax.random.normal(kb[0], (batch, n_nodes, in_features), jnp.float32)
    adjb = (jax.random.uniform(kb[1], (batch, n_nodes, n_nodes)) < 0.4
            ).astype(jnp.float32)
    adjb = jnp.maximum(adjb, jnp.eye(n_nodes, dtype=jnp.float32)[None])
    outb = jax.block_until_ready(
        gatv2_1l_forward_batched(hb, w, attn_w, adjb,
                                 n_heads=n_heads, n_hidden=n_classes))
    refb = jax.vmap(lambda hh, aa: _reference(hh, w, attn_w, aa,
                                              n_heads=n_heads,
                                              n_hidden=n_classes))(hb, adjb)
    np.testing.assert_allclose(np.asarray(outb), np.asarray(refb),
                               rtol=1e-4, atol=1e-4)

    print("KERNEL_OK")
</pallas_src>

<mosaic_0001>
module attributes {stable_mosaic.version = 11 : i64} {
  func.func @_gatv2_kernel(%arg0: i32, %arg1: memref<1x8x32xf32, #tpu.memory_space<vmem>>, %arg2: memref<32x64xf32, #tpu.memory_space<vmem>>, %arg3: memref<64x4xf32, #tpu.memory_space<vmem>>, %arg4: memref<1x64x1xf32, #tpu.memory_space<vmem>>, %arg5: memref<4x32xf32, #tpu.memory_space<vmem>>, %arg6: memref<64x32xf32, #tpu.memory_space<vmem>>, %arg7: memref<8x64xf32, #tpu.memory_space<vmem>>, %arg8: memref<16x128xf32, #tpu.memory_space<vmem>>, %arg9: memref<1x8x128xf32, #tpu.memory_space<vmem>>) attributes {dimension_semantics = [#tpu.dimension_semantics<parallel>], iteration_bounds = array<i64: 1>, scalar_prefetch = 0 : i64, scratch_operands = 0 : i64, tpu.core_type = #tpu.core_type<tc>, window_params = [{transform_indices = @transform_0, window_bounds = array<i64: 1, 8, 32>}, {pipeline_mode = #tpu.pipeline_mode<synchronous>, transform_indices = @transform_1, window_bounds = array<i64: 32, 64>}, {pipeline_mode = #tpu.pipeline_mode<synchronous>, transform_indices = @transform_2, window_bounds = array<i64: 64, 4>}, {transform_indices = @transform_3, window_bounds = array<i64: 1, 64, 1>}, {pipeline_mode = #tpu.pipeline_mode<synchronous>, transform_indices = @transform_4, window_bounds = array<i64: 4, 32>}, {pipeline_mode = #tpu.pipeline_mode<synchronous>, transform_indices = @transform_5, window_bounds = array<i64: 64, 32>}, {pipeline_mode = #tpu.pipeline_mode<synchronous>, transform_indices = @transform_6, window_bounds = array<i64: 8, 64>}, {pipeline_mode = #tpu.pipeline_mode<synchronous>, transform_indices = @transform_7, window_bounds = array<i64: 16, 128>}, {transform_indices = @transform_8, window_bounds = array<i64: 1, 8, 128>}]} {
    %c0 = arith.constant 0 : index
    %c0_0 = arith.constant 0 : index
    %c0_1 = arith.constant 0 : index
    %0 = vector.load %arg1[%c0, %c0_0, %c0_1] : memref<1x8x32xf32, #tpu.memory_space<vmem>>, vector<1x8x32xf32>
    %1 = vector.shape_cast %0 : vector<1x8x32xf32> to vector<8x32xf32>
    %c0_2 = arith.constant 0 : index
    %c0_3 = arith.constant 0 : index
    %2 = vector.load %arg2[%c0_2, %c0_3] : memref<32x64xf32, #tpu.memory_space<vmem>>, vector<32x64xf32>
    %cst = arith.constant dense<0.000000e+00> : vector<8x64xf32>
    %3 = tpu.matmul %1, %2, %cst {dimension_numbers = #tpu.dot_dimension_numbers<[1], [0], [0], [1], [0, 0, 1, 1], [], []>} : vector<8x32xf32>, vector<32x64xf32>, vector<8x64xf32> -> vector<8x64xf32>
    %4 = vector.shape_cast %3 : vector<8x64xf32> to vector<8x1x64xf32>
    %5 = vector.shape_cast %3 : vector<8x64xf32> to vector<1x8x64xf32>
    %6 = vector.broadcast %4 : vector<8x1x64xf32> to vector<8x8x64xf32>
    %7 = vector.broadcast %5 : vector<1x8x64xf32> to vector<8x8x64xf32>
    %8 = arith.addf %6, %7 : vector<8x8x64xf32>
    %cst_4 = arith.constant 0.000000e+00 : f32
    %9 = vector.broadcast %cst_4 : f32 to vector<8x8x64xf32>
    %10 = arith.cmpf oge, %8, %9 : vector<8x8x64xf32>
    %cst_5 = arith.constant 2.000000e-01 : f32
    %11 = vector.broadcast %cst_5 : f32 to vector<8x8x64xf32>
    %12 = arith.mulf %11, %8 : vector<8x8x64xf32>
    %13 = arith.select %10, %8, %12 : vector<8x8x64xi1>, vector<8x8x64xf32>
    %14 = vector.shape_cast %13 : vector<8x8x64xf32> to vector<64x64xf32>
    %c0_6 = arith.constant 0 : index
    %c0_7 = arith.constant 0 : index
    %15 = vector.load %arg3[%c0_6, %c0_7] : memref<64x4xf32, #tpu.memory_space<vmem>>, vector<64x4xf32>
    %cst_8 = arith.constant dense<0.000000e+00> : vector<64x4xf32>
    %16 = tpu.matmul %14, %15, %cst_8 {dimension_numbers = #tpu.dot_dimension_numbers<[1], [0], [0], [1], [0, 0, 1, 1], [], []>} : vector<64x64xf32>, vector<64x4xf32>, vector<64x4xf32> -> vector<64x4xf32>
    %c0_9 = arith.constant 0 : index
    %c0_10 = arith.constant 0 : index
    %c0_11 = arith.constant 0 : index
    %17 = vector.load %arg4[%c0_9, %c0_10, %c0_11] : memref<1x64x1xf32, #tpu.memory_space<vmem>>, vector<1x64x1xf32>
    %18 = vector.shape_cast %17 : vector<1x64x1xf32> to vector<64x1xf32>
    %19 = vector.broadcast %18 : vector<64x1xf32> to vector<64x4xf32>
    %20 = arith.addf %16, %19 : vector<64x4xf32>
    %21 = vector.shape_cast %20 : vector<64x4xf32> to vector<8x8x4xf32>
    %cst_12 = arith.constant dense<0xFF800000> : vector<8x4xf32>
    %22 = vector.multi_reduction <maximumf>, %21, %cst_12 [1] : vector<8x8x4xf32> to vector<8x4xf32>
    %23 = vector.shape_cast %22 : vector<8x4xf32> to vector<8x1x4xf32>
    %24 = vector.broadcast %23 : vector<8x1x4xf32> to vector<8x8x4xf32>
    %25 = arith.subf %21, %24 : vector<8x8x4xf32>
    %26 = math.exp %25 : vector<8x8x4xf32>
    %cst_13 = arith.constant dense<0.000000e+00> : vector<8x4xf32>
    %27 = vector.multi_reduction <add>, %26, %cst_13 [1] : vector<8x8x4xf32> to vector<8x4xf32>
    %28 = vector.shape_cast %27 : vector<8x4xf32> to vector<8x1x4xf32>
    %29 = tpu.reciprocal %28 : vector<8x1x4xf32> -> vector<8x1x4xf32>
    %cst_14 = arith.constant 2.500000e-01 : f32
    %30 = vector.broadcast %cst_14 : f32 to vector<8x1x4xf32>
    %31 = arith.mulf %29, %30 : vector<8x1x4xf32>
    %32 = vector.broadcast %31 : vector<8x1x4xf32> to vector<8x8x4xf32>
    %33 = arith.mulf %26, %32 : vector<8x8x4xf32>
    %34 = vector.shape_cast %33 : vector<8x8x4xf32> to vector<64x4xf32>
    %c0_15 = arith.constant 0 : index
    %c0_16 = arith.constant 0 : index
    %35 = vector.load %arg5[%c0_15, %c0_16] : memref<4x32xf32, #tpu.memory_space<vmem>>, vector<4x32xf32>
    %cst_17 = arith.constant dense<0.000000e+00> : vector<64x32xf32>
    %36 = tpu.matmul %34, %35, %cst_17 {dimension_numbers = #tpu.dot_dimension_numbers<[1], [0], [0], [1], [0, 0, 1, 1], [], []>} : vector<64x4xf32>, vector<4x32xf32>, vector<64x32xf32> -> vector<64x32xf32>
    %c0_18 = arith.constant 0 : index
    %c0_19 = arith.constant 0 : index
    %37 = vector.load %arg6[%c0_18, %c0_19] : memref<64x32xf32, #tpu.memory_space<vmem>>, vector<64x32xf32>
    %38 = arith.mulf %36, %37 : vector<64x32xf32>
    %c0_20 = arith.constant 0 : index
    %c0_21 = arith.constant 0 : index
    %39 = vector.load %arg7[%c0_20, %c0_21] : memref<8x64xf32, #tpu.memory_space<vmem>>, vector<8x64xf32>
    %cst_22 = arith.constant dense<0.000000e+00> : vector<8x32xf32>
    %40 = tpu.matmul %39, %38, %cst_22 {dimension_numbers = #tpu.dot_dimension_numbers<[1], [0], [0], [1], [0, 0, 1, 1], [], []>} : vector<8x64xf32>, vector<64x32xf32>, vector<8x32xf32> -> vector<8x32xf32>
    %41 = vector.extract_strided_slice %3 {offsets = [0, 0], sizes = [8, 16], strides = [1, 1]} : vector<8x64xf32> to vector<8x16xf32>
    %42 = vector.extract_strided_slice %3 {offsets = [0, 16], sizes = [8, 16], strides = [1, 1]} : vector<8x64xf32> to vector<8x16xf32>
    %43 = vector.extract_strided_slice %3 {offsets = [0, 32], sizes = [8, 16], strides = [1, 1]} : vector<8x64xf32> to vector<8x16xf32>
    %44 = vector.extract_strided_slice %3 {offsets = [0, 48], sizes = [8, 16], strides = [1, 1]} : vector<8x64xf32> to vector<8x16xf32>
    %45 = tpu.concatenate %41, %42, %43, %44 in 0 : vector<8x16xf32>, vector<8x16xf32>, vector<8x16xf32>, vector<8x16xf32> -> vector<32x16xf32>
    %cst_23 = arith.constant dense<0.000000e+00> : vector<8x16xf32>
    %46 = tpu.matmul %40, %45, %cst_23 {dimension_numbers = #tpu.dot_dimension_numbers<[1], [0], [0], [1], [0, 0, 1, 1], [], []>} : vector<8x32xf32>, vector<32x16xf32>, vector<8x16xf32> -> vector<8x16xf32>
    %c0_24 = arith.constant 0 : index
    %c0_25 = arith.constant 0 : index
    %47 = vector.load %arg8[%c0_24, %c0_25] : memref<16x128xf32, #tpu.memory_space<vmem>>, vector<16x128xf32>
    %cst_26 = arith.constant dense<0.000000e+00> : vector<8x128xf32>
    %48 = tpu.matmul %46, %47, %cst_26 {dimension_numbers = #tpu.dot_dimension_numbers<[1], [0], [0], [1], [0, 0, 1, 1], [], []>} : vector<8x16xf32>, vector<16x128xf32>, vector<8x128xf32> -> vector<8x128xf32>
    %c0_27 = arith.constant 0 : index
    %c0_28 = arith.constant 0 : index
    %c0_29 = arith.constant 0 : index
    %49 = vector.load %arg9[%c0_27, %c0_28, %c0_29] : memref<1x8x128xf32, #tpu.memory_space<vmem>>, vector<1x8x128xf32>
    %50 = vector.shape_cast %49 : vector<1x8x128xf32> to vector<8x128xf32>
    %51 = vector.shape_cast %48 : vector<8x128xf32> to vector<1x8x128xf32>
    tpu.vector_store %arg9[%c0_27, %c0_28, %c0_29], %51 {strides = array<i32>} : memref<1x8x128xf32, #tpu.memory_space<vmem>>, vector<1x8x128xf32>,
    return
  }
  func.func @transform_0(%arg0: i32) -> (i32, i32, i32) {
    %c0_i32 = arith.constant 0 : i32
    %c0_i32_0 = arith.constant 0 : i32
    %c0_i32_1 = arith.constant 0 : i32
    return %arg0, %c0_i32, %c0_i32_0 : i32, i32, i32
  }
  func.func @transform_1(%arg0: i32) -> (i32, i32) {
    %c0_i32 = arith.constant 0 : i32
    %c0_i32_0 = arith.constant 0 : i32
    %c0_i32_1 = arith.constant 0 : i32
    return %c0_i32, %c0_i32_0 : i32, i32
  }
  func.func @transform_2(%arg0: i32) -> (i32, i32) {
    %c0_i32 = arith.constant 0 : i32
    %c0_i32_0 = arith.constant 0 : i32
    %c0_i32_1 = arith.constant 0 : i32
    return %c0_i32, %c0_i32_0 : i32, i32
  }
  func.func @transform_3(%arg0: i32) -> (i32, i32, i32) {
    %c0_i32 = arith.constant 0 : i32
    %c0_i32_0 = arith.constant 0 : i32
    %c0_i32_1 = arith.constant 0 : i32
    return %arg0, %c0_i32, %c0_i32_0 : i32, i32, i32
  }
  func.func @transform_4(%arg0: i32) -> (i32, i32) {
    %c0_i32 = arith.constant 0 : i32
    %c0_i32_0 = arith.constant 0 : i32
    %c0_i32_1 = arith.constant 0 : i32
    return %c0_i32, %c0_i32_0 : i32, i32
  }
  func.func @transform_5(%arg0: i32) -> (i32, i32) {
    %c0_i32 = arith.constant 0 : i32
    %c0_i32_0 = arith.constant 0 : i32
    %c0_i32_1 = arith.constant 0 : i32
    return %c0_i32, %c0_i32_0 : i32, i32
  }
  func.func @transform_6(%arg0: i32) -> (i32, i32) {
    %c0_i32 = arith.constant 0 : i32
    %c0_i32_0 = arith.constant 0 : i32
    %c0_i32_1 = arith.constant 0 : i32
    return %c0_i32, %c0_i32_0 : i32, i32
  }
  func.func @transform_7(%arg0: i32) -> (i32, i32) {
    %c0_i32 = arith.constant 0 : i32
    %c0_i32_0 = arith.constant 0 : i32
    %c0_i32_1 = arith.constant 0 : i32
    return %c0_i32, %c0_i32_0 : i32, i32
  }
  func.func @transform_8(%arg0: i32) -> (i32, i32, i32) {
    %c0_i32 = arith.constant 0 : i32
    %c0_i32_0 = arith.constant 0 : i32
    %c0_i32_1 = arith.constant 0 : i32
    return %arg0, %c0_i32, %c0_i32_0 : i32, i32, i32
  }
}

</mosaic_0001>

<bundles_post_ra>
// kernel: tpu_custom_call.1
= control target key start
LH: loop header
LB: loop body
LE: loop exit
PB: predicated region body
PF: predicated region fallthrough
CT: control target
= control target key end

     0   :  { %v783_v2 = vmov 0   ;;  %vm35_vm0 = vcmask 261120   ;;  %s1073_s0 = inlined_call_operand.vmem [shape: f32[1,8,32], index: 0, kind: input, shape index: {}]   ;;  %s1074_s1 = inlined_call_operand.vmem [shape: f32[32,64], index: 1, kind: input, shape index: {}]   ;;  %s1075_s2 = inlined_call_operand.vmem [shape: f32[64,4], index: 2, kind: input, shape index: {}]   ;;  %s1076_s3 = inlined_call_operand.vmem [shape: f32[1,64,1], index: 3, kind: input, shape index: {}]   ;;  %s1077_s4 = inlined_call_operand.vmem [shape: f32[4,32], index: 4, kind: input, shape index: {}]   ;;  %s1078_s5 = inlined_call_operand.vmem [shape: f32[64,32], index: 5, kind: input, shape index: {}]   ;;  %s1079_s6 = inlined_call_operand.vmem [shape: f32[8,64], index: 6, kind: input, shape index: {}]   ;;  %s1080_s7 = inlined_call_operand.vmem [shape: f32[16,128], index: 7, kind: input, shape index: {}]   ;;  %s1081_s8 = inlined_call_operand.hbm [shape: f32[1,8,128], index: 8, kind: output, shape index: {}]  }
   0x1   :  { %v34_v0 = vld [vmem:[%s1074_s1 + $0x18] sm:$0xff]  ;;  %v33_v1 = vld [vmem:[%s1074_s1 + $0x10] sm:$0xff]  ;;  %723 = vset.pattern.permute.xlu1 %v783_v2  ;;  %v127_v3 = vld [vmem:[%s1076_s3 + $0x20] sm:$0xff]  ;;  %722 = vset.pattern.permute.xlu0 %v783_v2 }
   0x2   :  { %51 = vmatpush.msra.mxu0 %v34_v0  ;;  %v32_v4 = vld [vmem:[%s1074_s1 + $0x8] sm:$0xff]  ;;  %153 = vperm.xlu1 %723, %v127_v3   ;;  %v125_v5 = vld [vmem:[%s1076_s3 + $0x10] sm:$0xff]  ;;  %v31_v7 = vld [vmem:[%s1074_s1] sm:$0xff] }
   0x3   :  { %v129_v6 = vld [vmem:[%s1076_s3 + $0x30] sm:$0xff]  ;;  %143 = vperm.xlu0 %722, %v125_v5   ;;  %724 = vset.pattern.permute.xlu2 %v783_v2  ;;  %v122_v8 = vld [vmem:[%s1075_s2 + $0x38] sm:$0xff]  ;;  %v30_v9 = vld [vmem:[%s1073_s0] sm:$0xff] }
   0x4   :  { %52 = vmatpush.msra.mxu0 %v33_v1  ;;  %163 = vperm.xlu2 %724, %v129_v6   ;;  %v121_v10 = vld [vmem:[%s1075_s2 + $0x30] sm:$0xff] }
   0x6   :  { %53 = vmatpush.msra.mxu0 %v32_v4 }
   0x7   :  { %13 = vsyncpa [#allocation3], 0  ;;  %204 = vmatpush.msra.mxu1 %v122_v8  ;;  %708 = vmatpush.msra.mxu3 %v122_v8  ;;  %v128_v11 = vld [vmem:[%s1076_s3 + $0x28] sm:$0xff]  ;;  %v126_v13 = vld [vmem:[%s1076_s3 + $0x18] sm:$0xff]  ;;  %s784_s22 = smov 112   ;;  %s785_s23 = smov 96  }
   0x8   :  { %54 = vmatpush.msra.mxu0 %v31_v7  ;;  %v120_v12 = vld [vmem:[%s1075_s2 + $0x28] sm:$0xff]  ;;  %v119_v14 = vld [vmem:[%s1075_s2 + $0x20] sm:$0xff]  ;;  %v130_v15 = vld [vmem:[%s1076_s3 + $0x38] sm:$0xff]  ;;  %vm171_vm1 = vcmask 523264   ;;  %vm527_vm4 = vcmask 1043456   ;;  %vm237_vm11 = vcmask 31744  }
   0x9   :  { %687 = vmatmul.msk.f32.vlgmr.msra.gmra.mxu0 %vm35_vm0, %v30_v9  ;;  %205 = vmatpush.msra.mxu1 %v121_v10  ;;  %v124_v16 = vld [vmem:[%s1076_s3 + $0x8] sm:$0xff]  ;;  %v123_v17 = vld [vmem:[%s1076_s3] sm:$0xff]  ;;  %v118_v18 = vld [vmem:[%s1075_s2 + $0x18] sm:$0xff] }
   0xa   :  { %709 = vmatpush.msra.mxu3 %v121_v10  ;;  %158 = vperm.xlu1 %723, %v128_v11   ;;  %v117_v19 = vld [vmem:[%s1075_s2 + $0x10] sm:$0xff]  ;;  %v116_v20 = vld [vmem:[%s1075_s2 + $0x8] sm:$0xff]  ;;  %v115_v21 = vld [vmem:[%s1075_s2] sm:$0xff]  ;;  %s786_s2 = smov 80  }
   0xb   :  { %206 = vmatpush.msra.mxu1 %v120_v12  ;;  %148 = vperm.xlu0 %722, %v126_v13   ;;  %v502_v40 = vld [vmem:[%s1077_s4] sm:$0xf] }
   0xc   :  { %710 = vmatpush.msra.mxu3 %v120_v12  ;;  %168 = vperm.xlu2 %724, %v130_v15  }
   0xd   :  { %207 = vmatpush.msra.mxu1 %v119_v14  ;;  %696 = vmatpush.msk.msrb.mxu0 %vm527_vm4, %v502_v40 }
   0xe   :  { %711 = vmatpush.msra.mxu3 %v119_v14  ;;  %716 = vmatpush.msk.msra.mxu2 %vm527_vm4, %v502_v40 }
   0xf   :  { %208 = vmatpush.msra.mxu1 %v118_v18 }
  0x10   :  { %712 = vmatpush.msra.mxu3 %v118_v18 }
  0x11   :  { %209 = vmatpush.msra.mxu1 %v117_v19 }
  0x12   :  { %138 = vperm.xlu1 %723, %v124_v16   ;;  %713 = vmatpush.msra.mxu3 %v117_v19 }
  0x13   :  { %133 = vperm.xlu0 %722, %v123_v17   ;;  %210 = vmatpush.msra.mxu1 %v116_v20 }
  0x14   :  { %714 = vmatpush.msra.mxu3 %v116_v20 }
  0x15   :  { %211 = vmatpush.msra.mxu1 %v115_v21 }
  0x16   :  { %715 = vmatpush.msra.mxu3 %v115_v21 }
  0x5e   :  { %v164_v63 = vpop.permute.xlu2 %163 }
  0x66   :  { %v169_v0 = vpop.permute.xlu2 %168 }
  0x74   :  { %v929_v2 = vpop.permute.xlu1 %153 }
  0x75   :  { %v144_v1 = vpop.permute.xlu0 %143 }
  0x7c   :  { %v159_v5 = vpop.permute.xlu1 %158 }
  0x7d   :  { %v149_v4 = vpop.permute.xlu0 %148 }
  0x84   :  { %v139_v7 = vpop.permute.xlu1 %138 }
  0x85   :  { %v134_v6 = vpop.permute.xlu0 %133 }
  0x86   :  { %v897_v22 = vpop.f32.mrf.mxu0 }
  0x87   :  { %612 = vrot.lane.b32.xlu1 %v897_v22, %s784_s22  ;;  %615 = vrot.lane.b32.xlu0 %v897_v22, %s785_s23  ;;  %v67_v23 = vperm.slane %v897_v22, 0  ;;  %v64_v24 = vrot.slane %v897_v22, 5  ;;  %v60_v25 = vrot.slane %v897_v22, 1  ;;  %v65_v26 = vrot.slane %v897_v22, 6 }
  0x88   :  { %618 = vrot.lane.b32.xlu2 %v897_v22, %s786_s2  ;;  %v61_v33 = vrot.slane %v897_v22, 2  ;;  %v66_v39 = vrot.slane %v897_v22, 7  ;;  %v62_v47 = vrot.slane %v897_v22, 3  ;;  %v63_v55 = vrot.slane %v897_v22, 4  ;;  %s678_s2 = sshll.u32 %s1081_s8, 4  ;;  %s679_s2 = int_to_ptr.hbm [resolvable:$true] %s678_s2 }
  0x89   :  { %v83_v27 = vadd.f32 %v67_v23, %v897_v22  ;;  %v72_v28 = vperm.slane %v64_v24, 0  ;;  %v68_v29 = vperm.slane %v60_v25, 0  ;;  %v73_v32 = vperm.slane %v65_v26, 0 }
  0x8a   :  { %v69_v42 = vperm.slane %v61_v33, 0  ;;  %v74_v44 = vperm.slane %v66_v39, 0  ;;  %v70_v51 = vperm.slane %v62_v47, 0  ;;  %v71_v58 = vperm.slane %v63_v55, 0 }
  0x8b   :  { %vm91_vm2 = vcmp.ge.f32.partialorder %v83_v27, 0.0  ;;  %v99_v30 = vmul.f32 0.2, %v83_v27  ;;  %v88_v31 = vadd.f32 %v72_v28, %v897_v22  ;;  %v84_v36 = vadd.f32 %v68_v29, %v897_v22 }
  0x8c   :  { %v89_v38 = vadd.f32 %v73_v32, %v897_v22  ;;  %v85_v46 = vadd.f32 %v69_v42, %v897_v22  ;;  %v90_v49 = vadd.f32 %v74_v44, %v897_v22  ;;  %v86_v54 = vadd.f32 %v70_v51, %v897_v22 }
  0x8d   :  { %v107_v34 = vsel %vm91_vm2, %v83_v27, %v99_v30  ;;  %vm96_vm3 = vcmp.ge.f32.partialorder %v88_v31, 0.0  ;;  %v104_v35 = vmul.f32 0.2, %v88_v31  ;;  %v100_v41 = vmul.f32 0.2, %v84_v36 }
  0x8e   :  { %688 = vmatmul.msk.f32.vlgmr.msra.gmra.mxu1 %vm171_vm1, %v107_v34  ;;  %vm92_vm5 = vcmp.ge.f32.partialorder %v84_v36, 0.0  ;;  %v105_v43 = vmul.f32 0.2, %v89_v38  ;;  %vm97_vm6 = vcmp.ge.f32.partialorder %v89_v38, 0.0  ;;  %v101_v50 = vmul.f32 0.2, %v85_v46 }
  0x8f   :  { %v112_v37 = vsel %vm96_vm3, %v88_v31, %v104_v35  ;;  %v108_v45 = vsel %vm92_vm5, %v84_v36, %v100_v41  ;;  %vm93_vm7 = vcmp.ge.f32.partialorder %v85_v46, 0.0  ;;  %v106_v52 = vmul.f32 0.2, %v90_v49 }
  0x90   :  { %693 = vmatmul.msk.f32.vlgmr.msra.gmra.mxu3 %vm171_vm1, %v112_v37  ;;  %v113_v48 = vsel %vm97_vm6, %v89_v38, %v105_v43  ;;  %vm98_vm8 = vcmp.ge.f32.partialorder %v90_v49, 0.0  ;;  %v109_v53 = vsel %vm93_vm7, %v85_v46, %v101_v50  ;;  %v102_v57 = vmul.f32 0.2, %v86_v54 }
  0x91   :  { %v114_v56 = vsel %vm98_vm8, %v90_v49, %v106_v52  ;;  %vm94_vm9 = vcmp.ge.f32.partialorder %v86_v54, 0.0  ;;  %v87_v60 = vadd.f32 %v71_v58, %v897_v22 }
  0x92   :  { %v110_v59 = vsel %vm94_vm9, %v86_v54, %v102_v57 }
  0x93   :  { %v103_v61 = vmul.f32 0.2, %v87_v60  ;;  %vm95_vm10 = vcmp.ge.f32.partialorder %v87_v60, 0.0 }
  0x95   :  { %v111_v62 = vsel %vm95_vm10, %v87_v60, %v103_v61 }
  0x96   :  { %689 = vmatmul.msk.f32.gmra.mxu1 %vm171_vm1, %v108_v45 }
  0x98   :  { %694 = vmatmul.msk.f32.gmra.mxu3 %vm171_vm1, %v113_v48 }
  0x9e   :  { %690 = vmatmul.msk.f32.gmra.mxu1 %vm171_vm1, %v109_v53 }
  0xa0   :  { %695 = vmatmul.msk.f32.gmra.mxu3 %vm171_vm1, %v114_v56 }
  0xa6   :  { %691 = vmatmul.msk.f32.gmra.mxu1 %vm171_vm1, %v110_v59 }
  0xae   :  { %692 = vmatmul.msk.f32.gmra.mxu1 %vm171_vm1, %v111_v62 }
  0xe2   :  { %v619_v3 = vpop.permute.xlu2 %618 }
  0xe3   :  { %636 = vmatpush.msra.mxu0 %v619_v3 }
  0xf9   :  { %v616_v8 = vpop.permute.xlu0 %615  ;;  %v613_v9 = vpop.permute.xlu1 %612 }
  0xfa   :  { %637 = vmatpush.msra.mxu0 %v616_v8 }
  0xfc   :  { %638 = vmatpush.msra.mxu0 %v613_v9 }
  0xfe   :  { %639 = vmatpush.msra.mxu0 %v897_v22 }
 0x10b   :  { %v213_v10 = vpop.f32.mrf.mxu1 }
 0x10c   :  { %v214_v11 = vadd.f32 %v213_v10, %v134_v6 }
 0x10e   :  { %v238_v12 = vsel %vm237_vm11, %v214_v11, -inf }
 0x10f   :  { %v239_v13 = vrot.slane %v238_v12, 4 }
 0x111   :  { %v240_v14 = vmax.f32 %v238_v12, %v239_v13 }
 0x113   :  { %v241_v15 = vrot.slane %v240_v14, 2  ;;  %v216_v16 = vpop.f32.mrf.mxu1  ;;  %v228_v17 = vpop.f32.mrf.mxu3 }
 0x114   :  { %v217_v18 = vadd.f32 %v216_v16, %v139_v7  ;;  %v229_v19 = vadd.f32 %v228_v17, %v159_v5 }
 0x115   :  { %v242_v20 = vmax.f32 %v240_v14, %v241_v15 }
 0x116   :  { %v245_v21 = vsel %vm237_vm11, %v217_v18, -inf  ;;  %v273_v23 = vsel %vm237_vm11, %v229_v19, -inf }
 0x117   :  { %v243_v24 = vrot.slane %v242_v20, 1  ;;  %v246_v25 = vrot.slane %v245_v21, 4  ;;  %v274_v22 = vrot.slane %v273_v23, 4 }
 0x119   :  { %v244_v26 = vmax.f32 %v242_v20, %v243_v24  ;;  %v247_v27 = vmax.f32 %v245_v21, %v246_v25  ;;  %v275_v28 = vmax.f32 %v273_v23, %v274_v22 }
 0x11b   :  { %v294_v29 = vsub.f32 %v214_v11, %v244_v26  ;;  %v248_v30 = vrot.slane %v247_v27, 2  ;;  %v276_v31 = vrot.slane %v275_v28, 2  ;;  %v219_v32 = vpop.f32.mrf.mxu1  ;;  %v231_v33 = vpop.f32.mrf.mxu3 }
 0x11c   :  { %v220_v34 = vadd.f32 %v219_v32, %v144_v1  ;;  %v232_v35 = vadd.f32 %v231_v33, %v164_v63 }
 0x11d   :  { %v302_v36 = vmul.f32 1.442695, %v294_v29  ;;  %v249_v37 = vmax.f32 %v247_v27, %v248_v30  ;;  %v277_v38 = vmax.f32 %v275_v28, %v276_v31 }
 0x11e   :  { %v252_v39 = vsel %vm237_vm11, %v220_v34, -inf  ;;  %v280_v40 = vsel %vm237_vm11, %v232_v35, -inf }
 0x11f   :  { %725 = vpow2.f32 %v302_v36  ;;  %v250_v41 = vrot.slane %v249_v37, 1  ;;  %v278_v42 = vrot.slane %v277_v38, 1  ;;  %v253_v43 = vrot.slane %v252_v39, 4 }
 0x120   :  { %v281_v44 = vrot.slane %v280_v40, 4 }
 0x121   :  { %v251_v45 = vmax.f32 %v249_v37, %v250_v41  ;;  %v279_v46 = vmax.f32 %v277_v38, %v278_v42  ;;  %v254_v47 = vmax.f32 %v252_v39, %v253_v43 }
 0x122   :  { %v282_v48 = vmax.f32 %v280_v40, %v281_v44 }
 0x123   :  { %v295_v49 = vsub.f32 %v217_v18, %v251_v45  ;;  %v299_v50 = vsub.f32 %v229_v19, %v279_v46  ;;  %v255_v51 = vrot.slane %v254_v47, 2  ;;  %v222_v52 = vpop.f32.mrf.mxu1  ;;  %v234_v53 = vpop.f32.mrf.mxu3 }
 0x124   :  { %v283_v54 = vrot.slane %v282_v48, 2  ;;  %v223_v55 = vadd.f32 %v222_v52, %v149_v4  ;;  %v235_v56 = vadd.f32 %v234_v53, %v169_v0 }
 0x125   :  { %v937_v57 = vpop.eup %725  ;;  %v304_v58 = vmul.f32 1.442695, %v295_v49  ;;  %v312_v59 = vmul.f32 1.442695, %v299_v50  ;;  %v256_v60 = vmax.f32 %v254_v47, %v255_v51 }
 0x126   :  { %v318_v61 = vsel %vm237_vm11, %v937_v57, 0.0  ;;  %v284_v62 = vmax.f32 %v282_v48, %v283_v54  ;;  %v259_v63 = vsel %vm237_vm11, %v223_v55, -inf  ;;  %v287_v1 = vsel %vm237_vm11, %v235_v56, -inf }
 0x127   :  { %v319_v3 = vrot.slane %v318_v61, 4  ;;  %727 = vpow2.f32 %v304_v58  ;;  %v257_v5 = vrot.slane %v256_v60, 1  ;;  %v260_v6 = vrot.slane %v259_v63, 4 }
 0x128   :  { %729 = vpow2.f32 %v312_v59  ;;  %v285_v4 = vrot.slane %v284_v62, 1  ;;  %v288_v0 = vrot.slane %v287_v1, 4 }
 0x129   :  { %v320_v7 = vadd.f32 %v319_v3, %v318_v61  ;;  %v258_v8 = vmax.f32 %v256_v60, %v257_v5  ;;  %v261_v9 = vmax.f32 %v259_v63, %v260_v6 }
 0x12a   :  { %v286_v10 = vmax.f32 %v284_v62, %v285_v4  ;;  %v289_v11 = vmax.f32 %v287_v1, %v288_v0 }
 0x12b   :  { %v321_v12 = vrot.slane %v320_v7, 2  ;;  %v296_v13 = vsub.f32 %v220_v34, %v258_v8  ;;  %v262_v14 = vrot.slane %v261_v9, 2  ;;  %v225_v15 = vpop.f32.mrf.mxu1 }
 0x12c   :  { %v300_v16 = vsub.f32 %v232_v35, %v286_v10  ;;  %v290_v17 = vrot.slane %v289_v11, 2  ;;  %v944_v18 = vadd.f32 %v225_v15, %v929_v2 }
 0x12d   :  { %v946_v19 = vpop.eup %727  ;;  %v322_v20 = vadd.f32 %v321_v12, %v320_v7  ;;  %v306_v21 = vmul.f32 1.442695, %v296_v13  ;;  %v263_v23 = vmax.f32 %v261_v9, %v262_v14 }
 0x12e   :  { %v948_v24 = vpop.eup %729  ;;  %v325_v25 = vsel %vm237_vm11, %v946_v19, 0.0  ;;  %v314_v22 = vmul.f32 1.442695, %v300_v16  ;;  %v291_v26 = vmax.f32 %v289_v11, %v290_v17  ;;  %v266_v27 = vsel %vm237_vm11, %v944_v18, -inf }
 0x12f   :  { %v323_v28 = vrot.slane %v322_v20, 1  ;;  %v326_v29 = vrot.slane %v325_v25, 4  ;;  %731 = vpow2.f32 %v306_v21  ;;  %v264_v2 = vrot.slane %v263_v23, 1 }
 0x130   :  { %733 = vpow2.f32 %v314_v22  ;;  %v292_v30 = vrot.slane %v291_v26, 1  ;;  %v353_v33 = vsel %vm237_vm11, %v948_v24, 0.0  ;;  %v267_v34 = vrot.slane %v266_v27, 4 }
 0x131   :  { %v324_v31 = vadd.f32 %v323_v28, %v322_v20  ;;  %v327_v32 = vadd.f32 %v326_v29, %v325_v25  ;;  %v265_v35 = vmax.f32 %v263_v23, %v264_v2  ;;  %v354_v39 = vrot.slane %v353_v33, 4 }
 0x132   :  { %v293_v36 = vmax.f32 %v291_v26, %v292_v30  ;;  %v268_v38 = vmax.f32 %v266_v27, %v267_v34 }
 0x133   :  { %735 = vrcp.f32 %v324_v31  ;;  %v328_v37 = vrot.slane %v327_v32, 2  ;;  %v297_v40 = vsub.f32 %v223_v55, %v265_v35  ;;  %v355_v52 = vadd.f32 %v354_v39, %v353_v33 }
 0x134   :  { %v301_v41 = vsub.f32 %v235_v56, %v293_v36  ;;  %v269_v44 = vrot.slane %v268_v38, 2  ;;  %v383_v6 = vand.u32 2147483647, %v324_v31  ;;  %v385_v4 = vand.u32 2147483648, %v324_v31 }
 0x135   :  { %v956_v42 = vpop.eup %731  ;;  %v329_v43 = vadd.f32 %v328_v37, %v327_v32  ;;  %v308_v47 = vmul.f32 1.442695, %v297_v40  ;;  %v356_v62 = vrot.slane %v355_v52, 2  ;;  %vm379_vm13 = vweird.f32 %v324_v31 }
 0x136   :  { %v958_v45 = vpop.eup %733  ;;  %v332_v46 = vsel %vm237_vm11, %v956_v42, 0.0  ;;  %v316_v48 = vmul.f32 1.442695, %v301_v41  ;;  %v270_v51 = vmax.f32 %v268_v38, %v269_v44  ;;  %vm384_vm15 = vcmp.eq.f32.partialorder %v383_v6, 8.507059e+37 }
 0x137   :  { %v330_v49 = vrot.slane %v329_v43, 1  ;;  %v333_v50 = vrot.slane %v332_v46, 4  ;;  %v360_v53 = vsel %vm237_vm11, %v958_v45, 0.0  ;;  %737 = vpow2.f32 %v308_v47 }
 0x138   :  { %739 = vpow2.f32 %v316_v48  ;;  %v271_v58 = vrot.slane %v270_v51, 1  ;;  %v361_v63 = vrot.slane %v360_v53, 4  ;;  %v357_v12 = vadd.f32 %v356_v62, %v355_v52 }
 0x139   :  { %v736_v54 = vpop.eup %735  ;;  %v964_v55 = vadd.f32 %v330_v49, %v329_v43  ;;  %v334_v56 = vadd.f32 %v333_v50, %v332_v46 }
 0x13a   :  { %v375_v59 = vmul.f32 %v736_v54, %v324_v31  ;;  %v272_v61 = vmax.f32 %v270_v51, %v271_v58  ;;  %vm380_vm12 = vweird.f32 %v736_v54  ;;  %v362_v13 = vadd.f32 %v361_v63, %v360_v53 }
 0x13b   :  { %741 = vrcp.f32 %v964_v55  ;;  %v335_v60 = vrot.slane %v334_v56, 2  ;;  %vm381_vm14 = vmor %vm379_vm13, %vm380_vm12  ;;  %v358_v2 = vrot.slane %v357_v12, 1  ;;  %v397_v31 = vand.u32 2147483647, %v964_v55 }
 0x13c   :  { %v376_v1 = vsub.f32 1.0, %v375_v59  ;;  %v298_v5 = vsub.f32 %v944_v18, %v272_v61  ;;  %v386_v18 = vor.u32 1.1754944e-38, %v385_v4  ;;  %v363_v26 = vrot.slane %v362_v13, 2 }
 0x13d   :  { %v336_v3 = vadd.f32 %v335_v60, %v334_v56  ;;  %v968_v0 = vpop.eup %737  ;;  %v399_v32 = vand.u32 2147483648, %v964_v55  ;;  %vm393_vm3 = vweird.f32 %v964_v55  ;;  %v989_v43 = vadd.f32 %v358_v2, %v357_v12 }
 0x13e   :  { %v377_v7 = vmul.f32 %v736_v54, %v376_v1  ;;  %v970_v8 = vpop.eup %739  ;;  %v339_v10 = vsel %vm237_vm11, %v968_v0, 0.0  ;;  %v310_v11 = vmul.f32 1.442695, %v298_v5  ;;  %v364_v37 = vadd.f32 %v363_v26, %v362_v13 }
 0x13f   :  { %v337_v9 = vrot.slane %v336_v3, 1  ;;  %v340_v14 = vrot.slane %v339_v10, 4  ;;  %v367_v21 = vsel %vm237_vm11, %v970_v8, 0.0  ;;  %vm398_vm5 = vcmp.eq.f32.partialorder %v397_v31, 8.507059e+37 }
 0x140   :  { %v378_v15 = vadd.f32 %v736_v54, %v377_v7  ;;  %743 = vpow2.f32 %v310_v11  ;;  %v368_v30 = vrot.slane %v367_v21, 4  ;;  %v365_v52 = vrot.slane %v364_v37, 1 }
 0x141   :  { %v742_v16 = vpop.eup %741  ;;  %v974_v17 = vadd.f32 %v337_v9, %v336_v3  ;;  %v341_v20 = vadd.f32 %v340_v14, %v339_v10 }
 0x142   :  { %v382_v23 = vsel %vm381_vm14, %v736_v54, %v378_v15  ;;  %v389_v25 = vmul.f32 %v742_v16, %v964_v55  ;;  %vm394_vm2 = vweird.f32 %v742_v16  ;;  %v369_v44 = vadd.f32 %v368_v30, %v367_v21 }
 0x143   :  { %745 = vrcp.f32 %v974_v17  ;;  %v387_v22 = vsel %vm384_vm15, %v386_v18, %v382_v23  ;;  %v342_v27 = vrot.slane %v341_v20, 2  ;;  %vm395_vm4 = vmor %vm393_vm3, %vm394_vm2  ;;  %v413_v58 = vand.u32 2147483648, %v974_v17 }
 0x144   :  { %v486_v28 = vmul.f32 0.25, %v387_v22  ;;  %v390_v29 = vsub.f32 1.0, %v389_v25  ;;  %v370_v55 = vrot.slane %v369_v44, 2  ;;  %v411_v61 = vand.u32 2147483647, %v974_v17 }
 0x145   :  { %v343_v33 = vadd.f32 %v342_v27, %v341_v20  ;;  %v996_v63 = vadd.f32 %v365_v52, %v364_v37  ;;  %vm407_vm7 = vweird.f32 %v974_v17  ;;  %v414_v6 = vor.u32 1.1754944e-38, %v413_v58 }
 0x146   :  { %v494_v34 = vmul.f32 %v937_v57, %v486_v28  ;;  %v391_v35 = vmul.f32 %v742_v16, %v390_v29  ;;  %v983_v36 = vpop.eup %743  ;;  %v400_v57 = vor.u32 1.1754944e-38, %v399_v32  ;;  %v371_v3 = vadd.f32 %v370_v55, %v369_v44 }
 0x147   :  { %v344_v38 = vrot.slane %v343_v33, 1  ;;  %v346_v39 = vsel %vm237_vm11, %v983_v36, 0.0  ;;  %vm412_vm9 = vcmp.eq.f32.partialorder %v411_v61, 8.507059e+37 }
 0x148   :  { %697 = vmatmul.msk.f32.vlgmr.msrb.gmra.mxu0 %vm237_vm11, %v494_v34  ;;  %v392_v40 = vadd.f32 %v742_v16, %v391_v35  ;;  %v347_v46 = vrot.slane %v346_v39, 4  ;;  %v372_v13 = vrot.slane %v371_v3, 1 }
 0x149   :  { %v746_v41 = vpop.eup %745  ;;  %v345_v47 = vadd.f32 %v344_v38, %v343_v33 }
 0x14a   :  { %v396_v48 = vsel %vm395_vm4, %v742_v16, %v392_v40  ;;  %v403_v49 = vmul.f32 %v746_v41, %v974_v17  ;;  %v348_v50 = vadd.f32 %v347_v46, %v346_v39  ;;  %vm408_vm6 = vweird.f32 %v746_v41 }
 0x14b   :  { %v401_v51 = vsel %vm398_vm5, %v400_v57, %v396_v48  ;;  %747 = vrcp.f32 %v345_v47  ;;  %vm409_vm8 = vmor %vm407_vm7, %vm408_vm6  ;;  %v427_v16 = vand.u32 2147483648, %v345_v47  ;;  %v425_v20 = vand.u32 2147483647, %v345_v47 }
 0x14c   :  { %v487_v53 = vmul.f32 0.25, %v401_v51  ;;  %v404_v54 = vsub.f32 1.0, %v403_v49  ;;  %749 = vrcp.f32 %v989_v43  ;;  %v349_v56 = vrot.slane %v348_v50, 2 }
 0x14d   :  { %751 = vrcp.f32 %v996_v63  ;;  %v1007_v21 = vadd.f32 %v372_v13, %v371_v3  ;;  %vm421_vm12 = vweird.f32 %v345_v47  ;;  %v428_v22 = vor.u32 1.1754944e-38, %v427_v16  ;;  %v579_v16 = vld [vmem:[%s1078_s5 + $0x38] sm:$0xff] }
 0x14e   :  { %v495_v59 = vmul.f32 %v946_v19, %v487_v53  ;;  %v405_v60 = vmul.f32 %v746_v41, %v404_v54  ;;  %v350_v62 = vadd.f32 %v349_v56, %v348_v50  ;;  %vm426_vm14 = vcmp.eq.f32.partialorder %v425_v20, 8.507059e+37 }
 0x14f   :  { %v455_v46 = vand.u32 2147483648, %v989_v43  ;;  %vm449_vm6 = vweird.f32 %v989_v43 }
 0x150   :  { %698 = vmatmul.msk.f32.gmra.mxu0 %vm237_vm11, %v495_v59  ;;  %v406_v1 = vadd.f32 %v746_v41, %v405_v60  ;;  %v351_v5 = vrot.slane %v350_v62, 1  ;;  %v467_v59 = vand.u32 2147483647, %v996_v63 }
 0x151   :  { %v748_v4 = vpop.eup %747  ;;  %v456_v52 = vor.u32 1.1754944e-38, %v455_v46 }
 0x152   :  { %v410_v7 = vsel %vm409_vm8, %v746_v41, %v406_v1  ;;  %v1000_v19 = vpop.eup %749  ;;  %v352_v9 = vadd.f32 %v351_v5, %v350_v62  ;;  %v417_v11 = vmul.f32 %v748_v4, %v345_v47  ;;  %vm422_vm10 = vweird.f32 %v748_v4 }
 0x153   :  { %v415_v10 = vsel %vm412_vm9, %v414_v6, %v410_v7  ;;  %v445_v17 = vmul.f32 %v1000_v19, %v989_v43  ;;  %v752_v25 = vpop.eup %751  ;;  %vm423_vm13 = vmor %vm421_vm12, %vm422_vm10  ;;  %vm450_vm2 = vweird.f32 %v1000_v19  ;;  %vm463_vm10 = vweird.f32 %v996_v63 }
 0x154   :  { %v488_v12 = vmul.f32 0.25, %v415_v10  ;;  %753 = vrcp.f32 %v352_v9  ;;  %v418_v14 = vsub.f32 1.0, %v417_v11  ;;  %v459_v32 = vmul.f32 %v752_v25, %v996_v63  ;;  %vm451_vm7 = vmor %vm449_vm6, %vm450_vm2 }
 0x155   :  { %v446_v26 = vsub.f32 1.0, %v445_v17  ;;  %755 = vrcp.f32 %v1007_v21  ;;  %v441_v34 = vand.u32 2147483648, %v352_v9  ;;  %v439_v37 = vand.u32 2147483647, %v352_v9 }
 0x156   :  { %v496_v15 = vmul.f32 %v956_v42, %v488_v12  ;;  %v419_v18 = vmul.f32 %v748_v4, %v418_v14  ;;  %vm435_vm3 = vweird.f32 %v352_v9  ;;  %v460_v40 = vsub.f32 1.0, %v459_v32 }
 0x157   :  { %v447_v31 = vmul.f32 %v1000_v19, %v446_v26  ;;  %v442_v44 = vor.u32 1.1754944e-38, %v441_v34  ;;  %vm440_vm5 = vcmp.eq.f32.partialorder %v439_v37, 8.507059e+37  ;;  %vm464_vm9 = vweird.f32 %v752_v25  ;;  %v645_v34 = vld [vmem:[%s1080_s7 + $0x8] sm:$0xff] }
 0x158   :  { %699 = vmatmul.msk.f32.vlgmr.msra.gmra.mxu2 %vm237_vm11, %v496_v15  ;;  %v420_v23 = vadd.f32 %v748_v4, %v419_v18  ;;  %v461_v50 = vmul.f32 %v752_v25, %v460_v40  ;;  %vm465_vm12 = vmor %vm463_vm10, %vm464_vm9  ;;  %v483_v5 = vand.u32 2147483648, %v1007_v21  ;;  %664 = vmatpush.msrb.mxu0 %v645_v34 }
 0x159   :  { %v448_v39 = vadd.f32 %v1000_v19, %v447_v31 }
 0x15a   :  { %v754_v27 = vpop.eup %753  ;;  %v424_v28 = vsel %vm423_vm13, %v748_v4, %v420_v23  ;;  %v462_v55 = vadd.f32 %v752_v25, %v461_v50  ;;  %vm468_vm13 = vcmp.eq.f32.partialorder %v467_v59, 8.507059e+37  ;;  %v481_v4 = vand.u32 2147483647, %v1007_v21  ;;  %v576_v23 = vld [vmem:[%s1078_s5 + $0x20] sm:$0xff] }
 0x15b   :  { %v429_v42 = vsel %vm426_vm14, %v428_v22, %v424_v28  ;;  %v431_v29 = vmul.f32 %v754_v27, %v352_v9  ;;  %vm436_vm15 = vweird.f32 %v754_v27  ;;  %v756_v41 = vpop.eup %755  ;;  %v452_v49 = vsel %vm451_vm7, %v1000_v19, %v448_v39  ;;  %v575_v22 = vld [vmem:[%s1078_s5 + $0x18] sm:$0xff] }
 0x15c   :  { %v489_v2 = vmul.f32 0.25, %v429_v42  ;;  %vm437_vm4 = vmor %vm435_vm3, %vm436_vm15  ;;  %v473_v51 = vmul.f32 %v756_v41, %v1007_v21  ;;  %v466_v60 = vsel %vm465_vm12, %v752_v25, %v462_v55  ;;  %vm478_vm14 = vweird.f32 %v756_v41 }
 0x15d   :  { %v432_v30 = vsub.f32 1.0, %v431_v29  ;;  %vm477_vm15 = vweird.f32 %v1007_v21  ;;  %v484_v7 = vor.u32 1.1754944e-38, %v483_v5  ;;  %vm482_vm3 = vcmp.eq.f32.partialorder %v481_v4, 8.507059e+37  ;;  %v573_v29 = vld [vmem:[%s1078_s5 + $0x8] sm:$0xff] }
 0x15e   :  { %v497_v33 = vmul.f32 %v968_v0, %v489_v2  ;;  %v453_v0 = vand.u32 2147483647, %v989_v43  ;;  %v474_v56 = vsub.f32 1.0, %v473_v51  ;;  %v469_v43 = vand.u32 2147483648, %v996_v63  ;;  %vm479_vm2 = vmor %vm477_vm15, %vm478_vm14 }
 0x15f   :  { %v433_v35 = vmul.f32 %v754_v27, %v432_v30  ;;  %v572_v30 = vld [vmem:[%s1078_s5] sm:$0xff] }
 0x160   :  { %700 = vmatmul.msk.f32.gmra.mxu2 %vm237_vm11, %v497_v33  ;;  %vm454_vm8 = vcmp.eq.f32.partialorder %v453_v0, 8.507059e+37  ;;  %v475_v61 = vmul.f32 %v756_v41, %v474_v56  ;;  %v470_v62 = vor.u32 1.1754944e-38, %v469_v43  ;;  %v588_v33 = vld [vmem:[%s1079_s6] sm:$0xff] }
 0x161   :  { %v434_v38 = vadd.f32 %v754_v27, %v433_v35  ;;  %v457_v54 = vsel %vm454_vm8, %v456_v52, %v452_v49  ;;  %v644_v35 = vld [vmem:[%s1080_s7] sm:$0xff] }
 0x162   :  { %v491_v58 = vmul.f32 0.25, %v457_v54  ;;  %v471_v1 = vsel %vm468_vm13, %v470_v62, %v466_v60  ;;  %v476_v3 = vadd.f32 %v756_v41, %v475_v61  ;;  %665 = vmatpush.msrb.mxu0 %v644_v35 }
 0x163   :  { %v438_v57 = vsel %vm437_vm4, %v754_v27, %v434_v38  ;;  %v492_v6 = vmul.f32 0.25, %v471_v1  ;;  %v574_v27 = vld [vmem:[%s1078_s5 + $0x10] sm:$0xff] }
 0x164   :  { %v443_v47 = vsel %vm440_vm5, %v442_v44, %v438_v57  ;;  %v480_v63 = vsel %vm479_vm2, %v756_v41, %v476_v3 }
 0x165   :  { %v490_v48 = vmul.f32 0.25, %v443_v47  ;;  %v500_v19 = vmul.f32 %v958_v45, %v492_v6  ;;  %v578_v45 = vld [vmem:[%s1078_s5 + $0x30] sm:$0xff] }
 0x167   :  { %v498_v53 = vmul.f32 %v983_v36, %v490_v48  ;;  %v499_v36 = vmul.f32 %v948_v24, %v491_v58  ;;  %v485_v24 = vsel %vm482_vm3, %v484_v7, %v480_v63 }
 0x168   :  { %v493_v9 = vmul.f32 0.25, %v485_v24 }
 0x169   :  { %701 = vmatmul.msk.f32.gmra.mxu2 %vm237_vm11, %v498_v53 }
 0x16a   :  { %v501_v10 = vmul.f32 %v970_v8, %v493_v9  ;;  %v577_v8 = vld [vmem:[%s1078_s5 + $0x28] sm:$0xff]  ;;  %s787_s5 = smov [#allocation2]  }
 0x16b   :  { %s676_s6 = sshll.u32 %s787_s5, 4  ;;  %s677_s6 = int_to_ptr.vmem [resolvable:$true] %s676_s6 }
 0x171   :  { %702 = vmatmul.msk.f32.gmra.mxu2 %vm237_vm11, %v499_v36 }
 0x179   :  { %703 = vmatmul.msk.f32.gmra.mxu2 %vm237_vm11, %v500_v19 }
 0x181   :  { %704 = vmatmul.msk.f32.gmra.mxu2 %vm237_vm11, %v501_v10  ;;  %vm646_vm11 = vcmask 130048  }
 0x1c5   :  { %v548_v17 = vpop.f32.mrf.mxu0 }
 0x1c6   :  { %v580_v32 = vmul.f32 %v572_v30, %v548_v17 }
 0x1cd   :  { %v551_v42 = vpop.f32.mrf.mxu0 }
 0x1ce   :  { %v581_v31 = vmul.f32 %v573_v29, %v551_v42 }
 0x1db   :  { %v554_v11 = vpop.f32.mrf.mxu2 }
 0x1dc   :  { %v582_v2 = vmul.f32 %v574_v27, %v554_v11 }
 0x1e3   :  { %v557_v12 = vpop.f32.mrf.mxu2 }
 0x1e4   :  { %v583_v28 = vmul.f32 %v575_v22, %v557_v12 }
 0x1ec   :  { %v560_v13 = vpop.f32.mrf.mxu2 }
 0x1ed   :  { %v584_v26 = vmul.f32 %v576_v23, %v560_v13 }
 0x1f4   :  { %v563_v14 = vpop.f32.mrf.mxu2 }
 0x1f5   :  { %v585_v25 = vmul.f32 %v577_v8, %v563_v14 }
 0x1fc   :  { %v566_v15 = vpop.f32.mrf.mxu2 }
 0x1fd   :  { %v586_v21 = vmul.f32 %v578_v45, %v566_v15 }
 0x204   :  { %v569_v18 = vpop.f32.mrf.mxu2 }
 0x205   :  { %v587_v20 = vmul.f32 %v579_v16, %v569_v18 }
 0x207   :  { %600 = vmatpush.msrb.mxu3 %v587_v20 }
 0x209   :  { %601 = vmatpush.msrb.mxu3 %v586_v21 }
 0x20b   :  { %602 = vmatpush.msrb.mxu3 %v585_v25 }
 0x20d   :  { %603 = vmatpush.msrb.mxu3 %v584_v26 }
 0x20f   :  { %604 = vmatpush.msrb.mxu3 %v583_v28 }
 0x211   :  { %605 = vmatpush.msrb.mxu3 %v582_v2 }
 0x213   :  { %606 = vmatpush.msrb.mxu3 %v581_v31 }
 0x215   :  { %607 = vmatpush.msrb.mxu3 %v580_v32 }
 0x216   :  { %705 = vmatmul.msk.f32.vlgmr.msrb.gmra.mxu3 %vm171_vm1, %v588_v33 }
 0x299   :  { %v609_v37 = vpop.f32.mrf.mxu3 }
 0x29a   :  { %706 = vmatmul.msk.f32.vlgmr.msra.gmra.mxu0 %vm35_vm0, %v609_v37 }
 0x317   :  { %v641_v38 = vpop.f32.mrf.mxu0 }
 0x318   :  { %707 = vmatmul.msk.f32.vlgmr.msrb.gmra.mxu0 %vm646_vm11, %v641_v38 }
 0x395   :  { %v667_v39 = vpop.f32.mrf.mxu0 }
 0x396   :  { %670 = vst [vmem:[#allocation2] sm:$0xff] %v667_v39 }
 0x397   :  { %681 = dma.vmem_to_hbm [thread:$0]  %s677_s6, 128, %s679_s2, [#allocation3]  }
 0x398   :  { %781 = dma.done.wait [#allocation3], 128  }
 0x399   :  { %782 = vsyncadd [#allocation3], 4294967168 }
 0x39a   :  { %686 = vsyncpa [#allocation3], 1 }

</bundles_post_ra>
